<compile_context>
chip_gen: v7x
topology: tpu7x:2x2x1
jax: 0.10.0
libtpu: 0.0.40
codegen_flags: <defaults>
</compile_context>

<pallas_src>
import jax
import jax.numpy as jnp
from jax.experimental import pallas as pl
from jax.experimental.pallas import tpu as pltpu


def _largest_divisor_leq(n: int, cap: int) -> int:
    cap = max(1, min(n, cap))
    for d in range(cap, 0, -1):
        if n % d == 0:
            return d
    return 1


def _choose_t_tile(T: int, Bb: int, D: int, itemsize: int,
                   budget_bytes: int = 4 * 1024 * 1024) -> int:
    """Largest T tile that (a) divides T, (b) is a multiple of 8 (or == T),
    (c) keeps a single c block under ~budget_bytes."""
    target = budget_bytes // max(1, Bb * D * itemsize)
    if target >= T:
        return T
    t = (min(target, T) // 8) * 8
    while t >= 8:
        if T % t == 0:
            return t
        t -= 8
    return T  # fallback: no T tiling


def attention_kernel(qw_ref, c_ref, z_ref, m_sc, l_sc, acc_sc):
    # Per-grid-step tiles:
    #   qw_ref : (Bb, 1, D)   -- precomputed q @ W
    #   c_ref  : (Bb, Tt, D)  -- streamed context tile
    #   z_ref  : (Bb, 1, D)   -- output (resident across the T axis)
    # Scratch (persist across the T axis): running max / sum / accumulator.
    t = pl.program_id(1)

    @pl.when(t == 0)
    def _():
        m_sc[...] = jnp.full(m_sc.shape, -jnp.inf, m_sc.dtype)
        l_sc[...] = jnp.zeros(l_sc.shape, l_sc.dtype)
        acc_sc[...] = jnp.zeros(acc_sc.shape, acc_sc.dtype)

    qw = qw_ref[...]          # (Bb, 1, D)
    c = c_ref[...]            # (Bb, Tt, D)

    # s[b, 0, t] = sum_d qw[b, 0, d] * c[b, t, d]   (contract lane dims, no transpose)
    s = jnp.einsum("bqd,btd->bqt", qw, c,
                   preferred_element_type=jnp.float32)          # (Bb, 1, Tt)

    # Online (flash-style) softmax accumulation over T tiles.
    m_prev = m_sc[...]                                          # (Bb, 1, 1)
    m_new = jnp.maximum(m_prev, jnp.max(s, axis=-1, keepdims=True))
    alpha = jnp.exp(m_prev - m_new)                             # (Bb, 1, 1)
    p = jnp.exp(s - m_new)                                      # (Bb, 1, Tt)

    l_sc[...] = alpha * l_sc[...] + jnp.sum(p, axis=-1, keepdims=True)
    acc_sc[...] = alpha * acc_sc[...] + jnp.einsum(
        "bqt,btd->bqd", p, c, preferred_element_type=jnp.float32)  # (Bb, 1, D)
    m_sc[...] = m_new

    @pl.when(t == pl.num_programs(1) - 1)
    def _():
        # approx=False keeps the 1e-5 tolerance of the test exactly.
        z_ref[...] = (acc_sc[...] *
                      pl.reciprocal(l_sc[...], approx=False)).astype(z_ref.dtype)


def attention_general(hidden, encoder_outputs, weight, bias):
    """hidden: (B, 1, D), encoder_outputs: (B, T, D), weight: (D, D) torch-Linear
    layout (out_features, in_features), bias: (D,) (unused: cancels under softmax)."""
    del bias  # q.b is constant over T -> shift-invariant softmax -> identical output.
    B, n_q, D = hidden.shape
    _, T, _ = encoder_outputs.shape
    assert n_q == 1

    # Tiny GEMM in the wrapper: qW[b, 0, d] = sum_e hidden[b, 0, e] * W[e, d].
    qw = jnp.einsum("bqe,ed->bqd", hidden, weight)              # (B, 1, D)

    itemsize = jnp.dtype(encoder_outputs.dtype).itemsize
    Bb = _largest_divisor_leq(B, 8)          # >=1 batch rows per step, divides B
    Tt = _choose_t_tile(T, Bb, D, itemsize)  # divides T, multiple of 8 (or == T)
    grid = (B // Bb, T // Tt)

    # VMEM budget: double-buffered inputs/outputs + scratch, with headroom,
    # clamped so it is always safe on v7x's 64 MiB per-TensorCore VMEM.
    c_blk = Bb * Tt * D * itemsize
    qz_blk = Bb * D * itemsize
    scratch = Bb * (2 + D) * 4
    need = 2 * (c_blk + 2 * qz_blk) + scratch
    vmem_limit = int(min(max(32 * 1024 * 1024, 4 * need), 56 * 1024 * 1024))

    return pl.pallas_call(
        attention_kernel,
        out_shape=jax.ShapeDtypeStruct((B, 1, D), hidden.dtype),
        grid_spec=pltpu.PrefetchScalarGridSpec(
            num_scalar_prefetch=0,
            grid=grid,
            in_specs=[
                pl.BlockSpec((Bb, 1, D), lambda b, t: (b, 0, 0)),   # qW
                pl.BlockSpec((Bb, Tt, D), lambda b, t: (b, t, 0)),  # context c
            ],
            out_specs=pl.BlockSpec((Bb, 1, D), lambda b, t: (b, 0, 0)),
            scratch_shapes=[
                pltpu.VMEM((Bb, 1, 1), jnp.float32),   # running max
                pltpu.VMEM((Bb, 1, 1), jnp.float32),   # running sum
                pltpu.VMEM((Bb, 1, D), jnp.float32),   # output accumulator
            ],
        ),
        compiler_params=pltpu.CompilerParams(
            dimension_semantics=("parallel", "arbitrary"),
            vmem_limit_bytes=vmem_limit,
        ),
    )(qw, encoder_outputs)


def attention_reference(hidden, encoder_outputs, weight, bias):
    # Exact PyTorch semantics (bias included) for verification.
    energy = jnp.einsum("btd,ed->bte", encoder_outputs, weight) + bias
    s = jnp.einsum("bqe,bte->bqt", hidden, energy)
    w = jax.nn.softmax(s, axis=-1)
    return jnp.einsum("bqt,btd->bqd", w, encoder_outputs)


if __name__ == "__main__":
    B, T, D = 2, 8, 32
    key = jax.random.PRNGKey(0)
    k1, k2, k3, k4 = jax.random.split(key, 4)

    hidden = jax.random.normal(k1, (B, 1, D), dtype=jnp.float32)           # query   (B,1,D)
    encoder_outputs = jax.random.normal(k2, (B, T, D), dtype=jnp.float32)  # context (B,T,D)

    # Deterministic nn.Linear(hidden_size, hidden_size) parameters.
    bound = 1.0 / (D ** 0.5)
    weight = jax.random.uniform(k3, (D, D), minval=-bound, maxval=bound, dtype=jnp.float32)
    bias = jax.random.uniform(k4, (D,), minval=-bound, maxval=bound, dtype=jnp.float32)

    z = attention_general(hidden, encoder_outputs, weight, bias)
    jax.block_until_ready(z)

    z_ref = attention_reference(hidden, encoder_outputs, weight, bias)
    assert z.shape == (B, 1, D)
    assert jnp.allclose(z, z_ref, atol=1e-5, rtol=1e-5), "mismatch vs reference"

    # TODO(synk): encoder_lengths masking (fill_context_mask) not exercised — optional arg,
    # default forward path (encoder_lengths=None) is fully implemented.
    print("KERNEL_OK")
</pallas_src>

<mosaic_0001>
module attributes {stable_mosaic.version = 11 : i64} {
  func.func @attention_kernel(%arg0: i32, %arg1: i32, %arg2: memref<2x1x32xf32, #tpu.memory_space<vmem>>, %arg3: memref<2x8x32xf32, #tpu.memory_space<vmem>>, %arg4: memref<2x1x32xf32, #tpu.memory_space<vmem>>, %arg5: memref<2x1x1xf32, #tpu.memory_space<vmem>>, %arg6: memref<2x1x1xf32, #tpu.memory_space<vmem>>, %arg7: memref<2x1x32xf32, #tpu.memory_space<vmem>>) attributes {dimension_semantics = [#tpu.dimension_semantics<parallel>, #tpu.dimension_semantics<arbitrary>], iteration_bounds = array<i64: 1, 1>, scalar_prefetch = 0 : i64, scratch_operands = 3 : i64, tpu.core_type = #tpu.core_type<tc>, window_params = [{transform_indices = @transform_0, window_bounds = array<i64: 2, 1, 32>}, {transform_indices = @transform_1, window_bounds = array<i64: 2, 8, 32>}, {transform_indices = @transform_2, window_bounds = array<i64: 2, 1, 32>}]} {
    %c0_i32 = arith.constant 0 : i32
    %0 = arith.cmpi eq, %arg1, %c0_i32 : i32
    %1 = arith.extui %0 : i1 to i32
    %c0_i32_0 = arith.constant 0 : i32
    %2 = arith.cmpi ne, %1, %c0_i32_0 : i32
    scf.if %2 {
      %cst_29 = arith.constant 0xFF800000 : f32
      %31 = vector.broadcast %cst_29 : f32 to vector<2x1x1xf32>
      %c0_30 = arith.constant 0 : index
      %c0_31 = arith.constant 0 : index
      %c0_32 = arith.constant 0 : index
      %32 = vector.load %arg5[%c0_30, %c0_31, %c0_32] : memref<2x1x1xf32, #tpu.memory_space<vmem>>, vector<2x1x1xf32>
      tpu.vector_store %arg5[%c0_30, %c0_31, %c0_32], %31 {strides = array<i32>} : memref<2x1x1xf32, #tpu.memory_space<vmem>>, vector<2x1x1xf32>,
      %cst_33 = arith.constant 0.000000e+00 : f32
      %33 = vector.broadcast %cst_33 : f32 to vector<2x1x1xf32>
      %c0_34 = arith.constant 0 : index
      %c0_35 = arith.constant 0 : index
      %c0_36 = arith.constant 0 : index
      %34 = vector.load %arg6[%c0_34, %c0_35, %c0_36] : memref<2x1x1xf32, #tpu.memory_space<vmem>>, vector<2x1x1xf32>
      tpu.vector_store %arg6[%c0_34, %c0_35, %c0_36], %33 {strides = array<i32>} : memref<2x1x1xf32, #tpu.memory_space<vmem>>, vector<2x1x1xf32>,
      %cst_37 = arith.constant 0.000000e+00 : f32
      %35 = vector.broadcast %cst_37 : f32 to vector<2x1x32xf32>
      %c0_38 = arith.constant 0 : index
      %c0_39 = arith.constant 0 : index
      %c0_40 = arith.constant 0 : index
      %36 = vector.load %arg7[%c0_38, %c0_39, %c0_40] : memref<2x1x32xf32, #tpu.memory_space<vmem>>, vector<2x1x32xf32>
      tpu.vector_store %arg7[%c0_38, %c0_39, %c0_40], %35 {strides = array<i32>} : memref<2x1x32xf32, #tpu.memory_space<vmem>>, vector<2x1x32xf32>,
    } else {
    }
    %c0 = arith.constant 0 : index
    %c0_1 = arith.constant 0 : index
    %c0_2 = arith.constant 0 : index
    %3 = vector.load %arg2[%c0, %c0_1, %c0_2] : memref<2x1x32xf32, #tpu.memory_space<vmem>>, vector<2x1x32xf32>
    %c0_3 = arith.constant 0 : index
    %c0_4 = arith.constant 0 : index
    %c0_5 = arith.constant 0 : index
    %4 = vector.load %arg3[%c0_3, %c0_4, %c0_5] : memref<2x8x32xf32, #tpu.memory_space<vmem>>, vector<2x8x32xf32>
    "tpu.trace_start"() <{level = 10 : i32, message = "bqd,btd->bqt"}> : () -> ()
    %cst = arith.constant dense<0.000000e+00> : vector<2x1x8xf32>
    %5 = tpu.matmul %3, %4, %cst {dimension_numbers = #tpu.dot_dimension_numbers<[2], [2], [1], [1], [0, 0, 0, 1, 1, 1], [0], [0]>} : vector<2x1x32xf32>, vector<2x8x32xf32>, vector<2x1x8xf32> -> vector<2x1x8xf32>
    "tpu.trace_stop"() : () -> ()
    %c0_6 = arith.constant 0 : index
    %c0_7 = arith.constant 0 : index
    %c0_8 = arith.constant 0 : index
    %6 = vector.load %arg5[%c0_6, %c0_7, %c0_8] : memref<2x1x1xf32, #tpu.memory_space<vmem>>, vector<2x1x1xf32>
    %cst_9 = arith.constant dense<0xFF800000> : vector<2x1xf32>
    %7 = vector.multi_reduction <maximumf>, %5, %cst_9 [2] : vector<2x1x8xf32> to vector<2x1xf32>
    %8 = vector.shape_cast %7 : vector<2x1xf32> to vector<2x1x1xf32>
    %9 = arith.maximumf %6, %8 : vector<2x1x1xf32>
    %10 = arith.subf %6, %9 : vector<2x1x1xf32>
    %11 = math.exp %10 : vector<2x1x1xf32>
    %12 = vector.broadcast %9 : vector<2x1x1xf32> to vector<2x1x8xf32>
    %13 = arith.subf %5, %12 : vector<2x1x8xf32>
    %14 = math.exp %13 : vector<2x1x8xf32>
    %c0_10 = arith.constant 0 : index
    %c0_11 = arith.constant 0 : index
    %c0_12 = arith.constant 0 : index
    %15 = vector.load %arg6[%c0_10, %c0_11, %c0_12] : memref<2x1x1xf32, #tpu.memory_space<vmem>>, vector<2x1x1xf32>
    %16 = arith.mulf %11, %15 : vector<2x1x1xf32>
    %cst_13 = arith.constant dense<0.000000e+00> : vector<2x1xf32>
    %17 = vector.multi_reduction <add>, %14, %cst_13 [2] : vector<2x1x8xf32> to vector<2x1xf32>
    %18 = vector.shape_cast %17 : vector<2x1xf32> to vector<2x1x1xf32>
    %19 = arith.addf %16, %18 : vector<2x1x1xf32>
    %c0_14 = arith.constant 0 : index
    %c0_15 = arith.constant 0 : index
    %c0_16 = arith.constant 0 : index
    %20 = vector.load %arg6[%c0_14, %c0_15, %c0_16] : memref<2x1x1xf32, #tpu.memory_space<vmem>>, vector<2x1x1xf32>
    tpu.vector_store %arg6[%c0_14, %c0_15, %c0_16], %19 {strides = array<i32>} : memref<2x1x1xf32, #tpu.memory_space<vmem>>, vector<2x1x1xf32>,
    %c0_17 = arith.constant 0 : index
    %c0_18 = arith.constant 0 : index
    %c0_19 = arith.constant 0 : index
    %21 = vector.load %arg7[%c0_17, %c0_18, %c0_19] : memref<2x1x32xf32, #tpu.memory_space<vmem>>, vector<2x1x32xf32>
    %22 = vector.broadcast %11 : vector<2x1x1xf32> to vector<2x1x32xf32>
    %23 = arith.mulf %22, %21 : vector<2x1x32xf32>
    "tpu.trace_start"() <{level = 10 : i32, message = "bqt,btd->bqd"}> : () -> ()
    %cst_20 = arith.constant dense<0.000000e+00> : vector<2x1x32xf32>
    %24 = tpu.matmul %14, %4, %cst_20 {dimension_numbers = #tpu.dot_dimension_numbers<[2], [1], [1], [2], [0, 0, 0, 1, 1, 2], [0], [0]>} : vector<2x1x8xf32>, vector<2x8x32xf32>, vector<2x1x32xf32> -> vector<2x1x32xf32>
    "tpu.trace_stop"() : () -> ()
    %25 = arith.addf %23, %24 : vector<2x1x32xf32>
    %c0_21 = arith.constant 0 : index
    %c0_22 = arith.constant 0 : index
    %c0_23 = arith.constant 0 : index
    %26 = vector.load %arg7[%c0_21, %c0_22, %c0_23] : memref<2x1x32xf32, #tpu.memory_space<vmem>>, vector<2x1x32xf32>
    tpu.vector_store %arg7[%c0_21, %c0_22, %c0_23], %25 {strides = array<i32>} : memref<2x1x32xf32, #tpu.memory_space<vmem>>, vector<2x1x32xf32>,
    %c0_24 = arith.constant 0 : index
    %c0_25 = arith.constant 0 : index
    %c0_26 = arith.constant 0 : index
    %27 = vector.load %arg5[%c0_24, %c0_25, %c0_26] : memref<2x1x1xf32, #tpu.memory_space<vmem>>, vector<2x1x1xf32>
    tpu.vector_store %arg5[%c0_24, %c0_25, %c0_26], %9 {strides = array<i32>} : memref<2x1x1xf32, #tpu.memory_space<vmem>>, vector<2x1x1xf32>,
    %c0_i32_27 = arith.constant 0 : i32
    %28 = arith.cmpi eq, %arg1, %c0_i32_27 : i32
    %29 = arith.extui %28 : i1 to i32
    %c0_i32_28 = arith.constant 0 : i32
    %30 = arith.cmpi ne, %29, %c0_i32_28 : i32
    scf.if %30 {
      %c0_29 = arith.constant 0 : index
      %c0_30 = arith.constant 0 : index
      %c0_31 = arith.constant 0 : index
      %31 = vector.load %arg7[%c0_29, %c0_30, %c0_31] : memref<2x1x32xf32, #tpu.memory_space<vmem>>, vector<2x1x32xf32>
      %c0_32 = arith.constant 0 : index
      %c0_33 = arith.constant 0 : index
      %c0_34 = arith.constant 0 : index
      %32 = vector.load %arg6[%c0_32, %c0_33, %c0_34] : memref<2x1x1xf32, #tpu.memory_space<vmem>>, vector<2x1x1xf32>
      %33 = tpu.reciprocal %32 : vector<2x1x1xf32> -> vector<2x1x1xf32>
      %34 = vector.broadcast %33 : vector<2x1x1xf32> to vector<2x1x32xf32>
      %35 = arith.mulf %31, %34 : vector<2x1x32xf32>
      %c0_35 = arith.constant 0 : index
      %c0_36 = arith.constant 0 : index
      %c0_37 = arith.constant 0 : index
      %36 = vector.load %arg4[%c0_35, %c0_36, %c0_37] : memref<2x1x32xf32, #tpu.memory_space<vmem>>, vector<2x1x32xf32>
      tpu.vector_store %arg4[%c0_35, %c0_36, %c0_37], %35 {strides = array<i32>} : memref<2x1x32xf32, #tpu.memory_space<vmem>>, vector<2x1x32xf32>,
    } else {
    }
    return
  }
  func.func @transform_0(%arg0: i32, %arg1: i32) -> (i32, i32, i32) {
    %c0_i32 = arith.constant 0 : i32
    %c0_i32_0 = arith.constant 0 : i32
    %c0_i32_1 = arith.constant 0 : i32
    return %arg0, %c0_i32, %c0_i32_0 : i32, i32, i32
  }
  func.func @transform_1(%arg0: i32, %arg1: i32) -> (i32, i32, i32) {
    %c0_i32 = arith.constant 0 : i32
    %c0_i32_0 = arith.constant 0 : i32
    return %arg0, %arg1, %c0_i32 : i32, i32, i32
  }
  func.func @transform_2(%arg0: i32, %arg1: i32) -> (i32, i32, i32) {
    %c0_i32 = arith.constant 0 : i32
    %c0_i32_0 = arith.constant 0 : i32
    %c0_i32_1 = arith.constant 0 : i32
    return %arg0, %c0_i32, %c0_i32_0 : i32, i32, i32
  }
}

</mosaic_0001>

<bundles_post_ra>
// kernel: tpu_custom_call.1
= control target key start
LH: loop header
LB: loop body
LE: loop exit
PB: predicated region body
PF: predicated region fallthrough
CT: control target
= control target key end

     0   :  { %7 = vsyncpa [#allocation6], 0  ;;  %s731_s0 = inlined_call_operand.hbm [shape: f32[2,1,32], index: 0, kind: input, shape index: {}]   ;;  %s732_s1 = inlined_call_operand.hbm [shape: f32[2,8,32], index: 1, kind: input, shape index: {}]   ;;  %s733_s2 = inlined_call_operand.hbm [shape: f32[2,1,32], index: 2, kind: output, shape index: {}]  }
   0x1   :  { %8 = vsyncpa [#allocation9], 0 }
   0x2   :  { %9 = vsyncpa [#allocation7], 0  ;;  %s621_s9 = smov [#allocation5]   ;;  %s549_s13 = scalar_lea.hbm %s731_s0, 32 }
   0x3   :  { %s15_s10 = sshll.u32 %s621_s9, 4  ;;  %p550_p0 = scmp.ne.s32.totalorder %s731_s0, %s549_s13  ;;  %s16_s10 = int_to_ptr.vmem [resolvable:$true] %s15_s10 }
   0x4   :  { %p553_p1 = scmp.lt.u32.totalorder %s549_s13, %s731_s0 }
   0x6   :  { %p555_p2 = pnand %p553_p1, %p550_p0 }
   0x8   :  { %558 = shalt.err (!%p555_p2)
}
   0x9   :  { %s559_s18 = scalar_lea.vmem %s16_s10, 32  ;;  %p564_p4 = scmp.lt.s32.totalorder %s16_s10, %s16_s10 }
   0xa   :  { %p560_p3 = scmp.ne.s32.totalorder %s16_s10, %s559_s18  ;;  %p565_p5 = scmp.lt.s32.totalorder %s559_s18, %s559_s18 }
   0xc   :  { %p566_p6 = por %p565_p5, %p564_p4 }
   0xe   :  { %p567_p7 = pnand %p566_p6, %p560_p3 }
  0x10   :  { %570 = shalt.err (!%p567_p7)
}
  0x11   :  { %s622_s19 = smov 16   ;;  %s623_s20 = smov 1  }
  0x12   :  { %21 = dma.hbm_to_vmem [thread:$0]  %s731_s0, 32, %s16_s10, [#allocation6], %s622_s19, %s622_s19, %s623_s20  }
  0x13   :  { %s624_s23 = smov [#allocation8]   ;;  %s571_s27 = scalar_lea.hbm %s732_s1, 256 }
  0x14   :  { %s27_s24 = sshll.u32 %s624_s23, 4  ;;  %p572_p8 = scmp.ne.s32.totalorder %s732_s1, %s571_s27  ;;  %s28_s24 = int_to_ptr.vmem [resolvable:$true] %s27_s24 }
  0x15   :  { %p575_p9 = scmp.lt.u32.totalorder %s571_s27, %s732_s1 }
  0x17   :  { %p577_p10 = pnand %p575_p9, %p572_p8 }
  0x19   :  { %580 = shalt.err (!%p577_p10)
}
  0x1a   :  { %s581_s4 = scalar_lea.vmem %s28_s24, 256  ;;  %p586_p12 = scmp.lt.s32.totalorder %s28_s24, %s28_s24 }
  0x1b   :  { %p582_p11 = scmp.ne.s32.totalorder %s28_s24, %s581_s4  ;;  %p587_p13 = scmp.lt.s32.totalorder %s581_s4, %s581_s4 }
  0x1d   :  { %p588_p0 = por %p587_p13, %p586_p12 }
  0x1f   :  { %p589_p1 = pnand %p588_p0, %p582_p11 }
  0x21   :  { %592 = shalt.err (!%p589_p1)
}
  0x22   :  { %s625_s0 = smov 128   ;;  %s626_s5 = smov 8  }
  0x23   :  { %33 = dma.hbm_to_vmem [thread:$0]  %s732_s1, 256, %s28_s24, [#allocation9], %s625_s0, %s625_s0, %s626_s5  }
  0x24   :  { %615 = dma.done.wait [#allocation6], 32  }
  0x25   :  { %616 = vsyncadd [#allocation6], 4294967264 }
  0x26   :  { %617 = dma.done.wait [#allocation9], 256  }
  0x27   :  { %618 = vsyncadd [#allocation9], 4294967040  ;;  %v627_v0 = vmov 0.0   ;;  %vm628_vm0 = vmmov 0   ;;  %vm56_vm1 = vcmask 261120   ;;  %v54_v1 = vld [vmem:[#allocation8] sm:$0xff]  ;;  %v231_v21 = vlaneseq }
  0x28   :  { %504 = vmatprep.subr.mxu0 %v627_v0  ;;  %506 = vmatprep.mubr.msk.f32.mxu0 %vm628_vm0, %v627_v0  ;;  %v55_v2 = vld [vmem:[#allocation8 + $0x8] sm:$0xff]  ;;  %v52_v3 = vld [vmem:[#allocation5] sm:$0x1]  ;;  %v53_v4 = vld [vmem:[#allocation5 + $0x1] sm:$0x1]  ;;  %vm44_vm2 = vcmask 0  }
  0x29   :  { %509 = vmatprep.subr.mxu1 %v627_v0  ;;  %511 = vmatprep.mubr.msk.f32.mxu1 %vm628_vm0, %v627_v0  ;;  %v629_v5 = vmov -inf   ;;  %47 = vst.msk [vmem:[#allocation3] sm:$0x1] %vm44_vm2, %v627_v0  ;;  %48 = vst.msk [vmem:[#allocation3 + $0x1] sm:$0x1] %vm44_vm2, %v627_v0  ;;  %vm211_vm3 = vcmask 57344  }
  0x2a   :  { %505 = vmatpush3.xpose.msk.msra.mxu0 %vm56_vm1, %v54_v1  ;;  %510 = vmatpush3.xpose.msk.msra.mxu1 %vm56_vm1, %v55_v2  ;;  %45 = vst.msk [vmem:[#allocation2] sm:$0x1] %vm44_vm2, %v629_v5  ;;  %46 = vst.msk [vmem:[#allocation2 + $0x1] sm:$0x1] %vm44_vm2, %v629_v5  ;;  %v630_v12 = vmov 0   ;;  %v232_v22 = vshrl.u32 %v231_v21, 7 }
  0x2b   :  { %514 = vmatprep.subr.mxu0 %v627_v0  ;;  %519 = vmatprep.subr.mxu1 %v627_v0  ;;  %vm287_vm4 = vcmask 64512   ;;  %vm49_vm5 = vcmask 253952   ;;  %s631_s1 = smov [#allocation10]  }
  0x2c   :  { %535 = vset.pattern.permute.xlu1 %v630_v12  ;;  %536 = vset.pattern.permute.xlu0 %v630_v12  ;;  %v696_v23 = vsub.s32 0, %v232_v22  ;;  %50 = vst.msk [vmem:[#allocation4] sm:$0x1] %vm49_vm5, %v627_v0  ;;  %51 = vst.msk [vmem:[#allocation4 + $0x1] sm:$0x1] %vm49_vm5, %v627_v0  ;;  %s477_s8 = sshll.u32 %s631_s1, 4  ;;  %s478_s8 = int_to_ptr.vmem [resolvable:$true] %s477_s8 }
  0x2d   :  { %507 = vmatmul.mubr.msk.f32.vlgmr.msra.gmra.mrb[0].mxu0 %vm56_vm1, %v52_v3  ;;  %512 = vmatmul.mubr.msk.f32.vlgmr.msra.gmra.mrb[0].mxu1 %vm56_vm1, %v53_v4  ;;  %s593_s9 = scalar_lea.vmem %s478_s8, 32  ;;  %p598_p3 = scmp.lt.s32.totalorder %s478_s8, %s478_s8 }
  0x2e   :  { %515 = vmatpush3.msra.mxu0 %v54_v1  ;;  %516 = vmatprep.mubr.msk.f32.mxu0 %vm628_vm0, %v627_v0  ;;  %p594_p2 = scmp.ne.s32.totalorder %s478_s8, %s593_s9  ;;  %p599_p4 = scmp.lt.s32.totalorder %s593_s9, %s593_s9 }
  0x2f   :  { %520 = vmatpush3.msra.mxu1 %v55_v2  ;;  %521 = vmatprep.mubr.msk.f32.mxu1 %vm628_vm0, %v627_v0 }
  0x30   :  { %v250_v40 = vld [vmem:[#allocation3] sm:$0x1]  ;;  %v251_v43 = vld [vmem:[#allocation3 + $0x1] sm:$0x1]  ;;  %p600_p5 = por %p599_p4, %p598_p3 }
  0x31   :  { %v209_v13 = vld [vmem:[#allocation2] sm:$0x1]  ;;  %v210_v16 = vld [vmem:[#allocation2 + $0x1] sm:$0x1] }
  0x32   :  { %p601_p6 = pnand %p600_p5, %p594_p2 }
  0x33   :  { %v265_v55 = vld [vmem:[#allocation4] sm:$0x1]  ;;  %v266_v59 = vld [vmem:[#allocation4 + $0x1] sm:$0x1] }
 0x100   :  { %v129_v6 = vpop.f32.mrb[0].mxu0  ;;  %v205_v7 = vpop.f32.mrb[0].mxu1 }
 0x101   :  { %v508_v8 = vpop.f32.mrb[1].mxu0  ;;  %v212_v9 = vsel %vm211_vm3, %v129_v6, -inf  ;;  %v513_v10 = vpop.f32.mrb[1].mxu1  ;;  %v215_v11 = vsel %vm211_vm3, %v205_v7, -inf }
 0x102   :  { %213 = vmax.xlane.f32.xlu0 %v212_v9 }
 0x106   :  { %216 = vmax.xlane.f32.xlu0 %v215_v11 }
 0x18f   :  { %v214_v14 = vpop.xlane.xlu0 %213 }
 0x190   :  { %v218_v15 = vmax.f32 %v209_v13, %v214_v14 }
 0x192   :  { %v220_v17 = vsub.f32 %v209_v13, %v218_v15  ;;  %439 = vst.msk [vmem:[#allocation2] sm:$0x1] %vm44_vm2, %v218_v15  ;;  %228 = vperm.xlu1 %535, %v218_v15  }
 0x193   :  { %v217_v18 = vpop.xlane.xlu0 %216 }
 0x194   :  { %v219_v19 = vmax.f32 %v210_v16, %v217_v18  ;;  %v222_v37 = vmul.f32 1.442695, %v220_v17 }
 0x196   :  { %v221_v20 = vsub.f32 %v210_v16, %v219_v19  ;;  %440 = vst.msk [vmem:[#allocation2 + $0x1] sm:$0x1] %vm44_vm2, %v219_v19  ;;  %237 = vperm.xlu1 %535, %v219_v19  }
 0x198   :  { %v224_v36 = vmul.f32 1.442695, %v221_v20 }
 0x211   :  { %v229_v24 = vpop.permute.xlu1 %228 }
 0x212   :  { %v234_v25 = vrot.slane %v229_v24, %v696_v23 }
 0x214   :  { %v244_v26 = vsub.f32 %v129_v6, %v234_v25 }
 0x215   :  { %v238_v27 = vpop.permute.xlu1 %237 }
 0x216   :  { %v246_v28 = vmul.f32 1.442695, %v244_v26  ;;  %v243_v29 = vrot.slane %v238_v27, %v696_v23 }
 0x218   :  { %537 = vpow2.f32 %v246_v28  ;;  %v245_v30 = vsub.f32 %v205_v7, %v243_v29 }
 0x21a   :  { %v248_v31 = vmul.f32 1.442695, %v245_v30 }
 0x21c   :  { %539 = vpow2.f32 %v248_v31 }
 0x21d   :  { %541 = vpow2.f32 %v224_v36 }
 0x21e   :  { %543 = vpow2.f32 %v222_v37 }
 0x222   :  { %v538_v32 = vpop.eup %537 }
 0x223   :  { %517 = vmatmul.mubr.msk.f32.vlgmr.msra.gmra.mrb[2].mxu0 %vm287_vm4, %v538_v32  ;;  %v254_v33 = vsel %vm211_vm3, %v538_v32, 0.0 }
 0x224   :  { %255 = vadd.xlane.f32.xlu0 %v254_v33 }
 0x226   :  { %v540_v34 = vpop.eup %539 }
 0x227   :  { %522 = vmatmul.mubr.msk.f32.vlgmr.msra.gmra.mrb[2].mxu1 %vm287_vm4, %v540_v34  ;;  %v257_v35 = vsel %vm211_vm3, %v540_v34, 0.0  ;;  %v542_v38 = vpop.eup %541 }
 0x228   :  { %258 = vadd.xlane.f32.xlu1 %v257_v35  ;;  %v544_v39 = vpop.eup %543  ;;  %v253_v45 = vmul.f32 %v542_v38, %v251_v43 }
 0x229   :  { %v252_v41 = vmul.f32 %v544_v39, %v250_v40 }
 0x239   :  { %278 = vperm.xlu1 %535, %v542_v38  }
 0x23a   :  { %269 = vperm.xlu0 %536, %v544_v39  }
 0x2b1   :  { %v256_v42 = vpop.xlane.xlu0 %255 }
 0x2b2   :  { %v260_v44 = vadd.f32 %v256_v42, %v252_v41 }
 0x2b4   :  { %263 = vst.msk [vmem:[#allocation3] sm:$0x1] %vm44_vm2, %v260_v44 }
 0x2b5   :  { %v259_v46 = vpop.xlane.xlu1 %258 }
 0x2b6   :  { %v261_v47 = vadd.f32 %v259_v46, %v253_v45 }
 0x2b8   :  { %264 = vst.msk [vmem:[#allocation3 + $0x1] sm:$0x1] %vm44_vm2, %v261_v47 }
 0x2b9   :  { %v270_v52 = vpop.permute.xlu0 %269  ;;  %v279_v54 = vpop.permute.xlu1 %278 }
 0x2ba   :  { %v275_v53 = vrot.slane %v270_v52, %v696_v23  ;;  %v284_v56 = vrot.slane %v279_v54, %v696_v23 }
 0x2bb   :  { %v446_v48 = vld [vmem:[#allocation3] sm:$0x1] }
 0x2bc   :  { %545 = vrcp.f32 %v446_v48  ;;  %v285_v57 = vmul.f32 %v275_v53, %v265_v55  ;;  %v286_v62 = vmul.f32 %v284_v56, %v266_v59 }
 0x2bf   :  { %v447_v49 = vld [vmem:[#allocation3 + $0x1] sm:$0x1] }
 0x2c0   :  { %547 = vrcp.f32 %v447_v49 }
 0x2c6   :  { %v546_v50 = vpop.eup %545 }
 0x2c7   :  { %452 = vperm.xlu0 %536, %v546_v50  }
 0x2ca   :  { %v548_v51 = vpop.eup %547 }
 0x2cb   :  { %461 = vperm.xlu0 %536, %v548_v51  }
 0x2f6   :  { %v357_v58 = vpop.f32.mrb[2].mxu0 }
 0x2f7   :  { %v434_v60 = vadd.f32 %v357_v58, %v285_v57  ;;  %v518_v61 = vpop.f32.mrb[3].mxu0 }
 0x2f9   :  { %437 = vst.msk [vmem:[#allocation4] sm:$0x1] %vm49_vm5, %v434_v60 }
 0x2fa   :  { %v430_v63 = vpop.f32.mrb[2].mxu1 }
 0x2fb   :  { %v435_v0 = vadd.f32 %v430_v63, %v286_v62  ;;  %v523_v1 = vpop.f32.mrb[3].mxu1 }
 0x2fd   :  { %438 = vst.msk [vmem:[#allocation4 + $0x1] sm:$0x1] %vm49_vm5, %v435_v0 }
 0x300   :  { %v444_v4 = vld [vmem:[#allocation4] sm:$0x1] }
 0x304   :  { %v445_v8 = vld [vmem:[#allocation4 + $0x1] sm:$0x1] }
 0x346   :  { %v453_v2 = vpop.permute.xlu0 %452 }
 0x347   :  { %v458_v3 = vrot.slane %v453_v2, %v696_v23 }
 0x349   :  { %v468_v5 = vmul.f32 %v458_v3, %v444_v4 }
 0x34a   :  { %v462_v6 = vpop.permute.xlu0 %461 }
 0x34b   :  { %470 = vst.msk [vmem:[#allocation10] sm:$0x1] %vm49_vm5, %v468_v5  ;;  %v467_v7 = vrot.slane %v462_v6, %v696_v23 }
 0x34d   :  { %v469_v9 = vmul.f32 %v467_v7, %v445_v8 }
 0x34f   :  { %471 = vst.msk [vmem:[#allocation10 + $0x1] sm:$0x1] %vm49_vm5, %v469_v9 }
 0x350   :  { %604 = shalt.err (!%p601_p6)
}
 0x351   :  { %s605_s12 = scalar_lea.hbm %s733_s2, 32 }
 0x352   :  { %p606_p7 = scmp.ne.s32.totalorder %s733_s2, %s605_s12  ;;  %p609_p8 = scmp.lt.u32.totalorder %s605_s12, %s733_s2 }
 0x354   :  { %p611_p9 = pnand %p609_p8, %p606_p7 }
 0x356   :  { %614 = shalt.err (!%p611_p9)
}
 0x357   :  { %483 = dma.vmem_to_hbm [thread:$0]  %s478_s8, 32, %s733_s2, [#allocation7], %s622_s19, %s622_s19, %s623_s20  }
 0x358   :  { %619 = dma.done.wait [#allocation7], 32  }
 0x359   :  { %620 = vsyncadd [#allocation7], 4294967264 }
 0x35a   :  { %487 = vsyncpa [#allocation6], 1 }
 0x35b   :  { %488 = vsyncpa [#allocation9], 1 }
 0x35c   :  { %489 = vsyncpa [#allocation7], 1 }

</bundles_post_ra>
